<compile_context>
chip_gen: v5e
topology: v5e:2x2
jax: 0.10.0
libtpu: 0.0.40
codegen_flags: <defaults>
</compile_context>

<pallas_src>
import functools

import jax
import jax.numpy as jnp
from jax.experimental import pallas as pl
from jax.experimental.pallas import tpu as pltpu


def _dice_sums_kernel(x_ref, t_ref, out_ref, acc_ref, *, num_classes, tile_p,
                      hw, tiles_per_split, compute_dtype):
    """Per-tile partial dice sums.

    x_ref:   (C, TP)  logits tile (kept in input dtype; cast to compute_dtype)
    t_ref:   (1, TP)  integer labels tile (any int dtype; cast to int32)
    out_ref: (3, 1)   f32 [intersection, sum_softmax, sum_onehot] per (b, split)
    acc_ref: (8, TP)  f32 scratch; rows 0..2 are the lane-wise running sums
    """
    c = pl.program_id(1)          # core-split index
    j = pl.program_id(2)          # pixel-tile index within the split

    @pl.when(j == 0)
    def _():
        acc_ref[...] = jnp.zeros_like(acc_ref)

    x = x_ref[...].astype(compute_dtype)                     # (C, TP)
    t = t_ref[...].astype(jnp.int32)                          # (1, TP)

    # Numerically-stable softmax pieces over the channel (sublane) axis.
    m = jnp.max(x, axis=0, keepdims=True)                     # (1, TP)
    e = jnp.exp(x - m)                                        # (C, TP)

    # No materialized one-hot: select e where the class id matches the label.
    cls_ids = jax.lax.broadcasted_iota(jnp.int32, x.shape, 0)  # (C, TP)
    e_hit = jnp.where(cls_ids == t, e, jnp.zeros_like(e))      # (C, TP)

    s = jnp.sum(e, axis=0, keepdims=True).astype(jnp.float32)          # (1, TP)
    inter_num = jnp.sum(e_hit, axis=0, keepdims=True).astype(jnp.float32)

    # Ragged-tile mask: global pixel index = (c*tiles_per_split + j)*TP + lane.
    # Also masks duplicate (clamped) tiles when the tile count is odd.
    jt = c * tiles_per_split + j
    lane = jax.lax.broadcasted_iota(jnp.int32, (1, tile_p), 1)
    lane_valid = (jt * tile_p + lane) < hw                     # (1, TP) bool
    label_ok = jnp.logical_and(t >= 0, t < num_classes)        # (1, TP) bool

    # Exact reciprocal keeps bit-level parity with the reference; flip to
    # approx=True (EUP vrcp) if ~1e-3 per-lane relative error is acceptable.
    inv_s = pl.reciprocal(s, approx=False)

    # sum(softmax * one_hot):
    acc_ref[0:1, :] += jnp.where(lane_valid, inter_num * inv_s, 0.0)
    # sum(softmax) == 1.0 per valid pixel:
    acc_ref[1:2, :] += lane_valid.astype(jnp.float32)
    # sum(one_hot) == 1.0 per valid pixel with label in [0, C):
    acc_ref[2:3, :] += jnp.logical_and(lane_valid, label_ok).astype(jnp.float32)

    @pl.when(j == pl.num_programs(2) - 1)
    def _():
        out_ref[...] = jnp.sum(acc_ref[0:3, :], axis=1, keepdims=True)  # (3, 1)


def _tpu_generation():
    """Coarse TPU generation: 5 (v5e/older), 6 (v6e), 7 (v7x / newer)."""
    try:
        kind = jax.devices()[0].device_kind.lower()
    except Exception:
        return 6
    for tag, gen in (("v3", 5), ("v4", 5), ("v5", 5), ("v6", 6)):
        if tag in kind:
            return gen
    return 7


def _choose_tile(num_classes, x_itemsize, t_itemsize, comp_itemsize, hw, gen):
    """Lane-tile size from a per-chip bytes-per-step target + VMEM budget."""
    target_bytes = {5: 1 << 20, 6: 2 << 20, 7: 2 << 20}[gen]   # logits bytes/step
    vmem_budget = {5: 12 << 20, 6: 48 << 20, 7: 28 << 20}[gen]
    vmem_cap = {5: 96 << 20, 6: 96 << 20, 7: 48 << 20}[gen]

    hw_rounded = pl.cdiv(hw, 128) * 128
    tp = max(128, (target_bytes // max(1, num_classes * x_itemsize)) // 128 * 128)
    tp = min(tp, hw_rounded)

    def vmem_estimate(t):
        logits_dbuf = 2 * num_classes * t * x_itemsize       # double-buffered input
        tgt_dbuf = 2 * t * t_itemsize
        scratch = 8 * t * 4
        temps = 4 * num_classes * t * comp_itemsize           # e / e_hit / casts slack
        return logits_dbuf + tgt_dbuf + scratch + temps

    while tp > 128 and vmem_estimate(tp) > vmem_budget:
        tp = max(128, (tp // 2) // 128 * 128)

    vmem_limit = min(max(vmem_estimate(tp) + (8 << 20), 32 << 20), vmem_cap)
    return tp, int(vmem_limit)


@functools.partial(jax.jit, static_argnames=("loss_weight", "eps"))
def dice_loss_pallas(logits, targets, loss_weight=1.0, eps=1e-5):
    """DiceLoss.forward(inputs=logits NCHW, targets NHW int) -> scalar."""
    N, C, H, W = logits.shape
    HW = H * W
    gen = _tpu_generation()

    # Zero-copy reshapes.  No padding: ragged last tile is masked in-kernel.
    x = logits.reshape(N, C, HW)
    t = targets.reshape(N, 1, HW)
    # Keep small int label dtypes as-is (int8 labels cut label HBM traffic 4x);
    # only widen unsupported dtypes.  The kernel casts to int32 internally.
    if (not jnp.issubdtype(t.dtype, jnp.integer)) or jnp.dtype(t.dtype).itemsize > 4:
        t = t.astype(jnp.int32)

    # bf16 elementwise math only where the VPU/EUP support it (v6e / v7x).
    compute_dtype = (jnp.bfloat16
                     if (x.dtype == jnp.bfloat16 and gen >= 6)
                     else jnp.float32)

    tp, vmem_limit = _choose_tile(
        C,
        jnp.dtype(x.dtype).itemsize,
        jnp.dtype(t.dtype).itemsize,
        jnp.dtype(compute_dtype).itemsize,
        HW,
        gen,
    )

    num_tiles = pl.cdiv(HW, tp)
    n_split = 2 if num_tiles >= 2 else 1        # 2-way pixel split for v7x megacore
    tiles_per_split = pl.cdiv(num_tiles, n_split)

    def in_map(b, c, j):
        # Clamp the (possibly duplicate) last tile of an odd split; the kernel's
        # lane mask (built from the *unclamped* index) zeroes its contribution.
        return (b, 0, jnp.minimum(c * tiles_per_split + j, num_tiles - 1))

    kernel = functools.partial(
        _dice_sums_kernel,
        num_classes=C,
        tile_p=tp,
        hw=HW,
        tiles_per_split=tiles_per_split,
        compute_dtype=compute_dtype,
    )

    partials = pl.pallas_call(
        kernel,
        out_shape=jax.ShapeDtypeStruct((N, n_split, 3, 1), jnp.float32),
        grid_spec=pltpu.PrefetchScalarGridSpec(
            num_scalar_prefetch=0,
            grid=(N, n_split, tiles_per_split),
            in_specs=[
                pl.BlockSpec((None, C, tp), in_map),
                pl.BlockSpec((None, 1, tp), in_map),
            ],
            out_specs=pl.BlockSpec((None, None, 3, 1),
                                   lambda b, c, j: (b, c, 0, 0)),
            scratch_shapes=[pltpu.VMEM((8, tp), jnp.float32)],
        ),
        compiler_params=pltpu.CompilerParams(
            dimension_semantics=("parallel", "parallel", "arbitrary"),
            vmem_limit_bytes=vmem_limit,
        ),
    )(x, t)

    sums = jnp.sum(partials, axis=(0, 1))       # (3, 1)
    intersection = sums[0, 0]
    denominator = sums[1, 0] + sums[2, 0]
    dice_score = (2.0 * intersection + eps) / (denominator + eps)
    loss = 1.0 - dice_score
    # reduction='mean' on a 0-d loss is identity; per-sample weight is None.
    return loss_weight * loss


def _dice_loss_ref(logits, targets, loss_weight=1.0, eps=1e-5):
    """Pure-JAX reference mirroring the PyTorch code."""
    p = jax.nn.softmax(logits.astype(jnp.float32), axis=1)
    oh = jax.nn.one_hot(targets, logits.shape[1], dtype=jnp.float32)
    oh = jnp.transpose(oh, (0, 3, 1, 2))
    inter = jnp.sum(p * oh)
    denom = jnp.sum(p) + jnp.sum(oh)
    return loss_weight * (1.0 - (2.0 * inter + eps) / (denom + eps))


if __name__ == "__main__":
    key = jax.random.PRNGKey(0)
    k1, k2 = jax.random.split(key)

    N, C, H, W = 2, 4, 16, 16
    logits = jax.random.normal(k1, (N, C, H, W), dtype=jnp.float32)
    targets = jax.random.randint(k2, (N, H, W), 0, C, dtype=jnp.int32)

    loss = dice_loss_pallas(logits, targets, loss_weight=1.0, eps=1e-5)
    loss = jax.block_until_ready(loss)

    ref = _dice_loss_ref(logits, targets, loss_weight=1.0, eps=1e-5)
    assert jnp.allclose(loss, ref, atol=1e-5, rtol=1e-5), (loss, ref)

    print("KERNEL_OK")
</pallas_src>

<mosaic_0001>
module attributes {stable_mosaic.version = 11 : i64} {
  func.func @_dice_sums_kernel(%arg0: i32, %arg1: i32, %arg2: i32, %arg3: memref<1x4x256xf32, #tpu.memory_space<vmem>>, %arg4: memref<1x1x256xi32, #tpu.memory_space<vmem>>, %arg5: memref<1x1x3x1xf32, #tpu.memory_space<vmem>>, %arg6: memref<8x256xf32, #tpu.memory_space<vmem>>) attributes {dimension_semantics = [#tpu.dimension_semantics<parallel>, #tpu.dimension_semantics<parallel>, #tpu.dimension_semantics<arbitrary>], iteration_bounds = array<i64: 2, 1, 1>, scalar_prefetch = 0 : i64, scratch_operands = 1 : i64, tpu.core_type = #tpu.core_type<tc>, window_params = [{transform_indices = @transform_0, window_bounds = array<i64: 1, 4, 256>}, {transform_indices = @transform_1, window_bounds = array<i64: 1, 1, 256>}, {transform_indices = @transform_2, window_bounds = array<i64: 1, 1, 3, 1>}]} {
    %c0_i32 = arith.constant 0 : i32
    %0 = arith.cmpi eq, %arg2, %c0_i32 : i32
    %1 = arith.extui %0 : i1 to i32
    %c0_i32_0 = arith.constant 0 : i32
    %2 = arith.cmpi ne, %1, %c0_i32_0 : i32
    scf.if %2 {
      %cst_24 = arith.constant 0.000000e+00 : f32
      %55 = vector.broadcast %cst_24 : f32 to vector<8x256xf32>
      %c0_25 = arith.constant 0 : index
      %c0_26 = arith.constant 0 : index
      %56 = vector.load %arg6[%c0_25, %c0_26] : memref<8x256xf32, #tpu.memory_space<vmem>>, vector<8x256xf32>
      tpu.vector_store %arg6[%c0_25, %c0_26], %55 {strides = array<i32>} : memref<8x256xf32, #tpu.memory_space<vmem>>, vector<8x256xf32>,
    } else {
    }
    %c0 = arith.constant 0 : index
    %c0_1 = arith.constant 0 : index
    %c0_2 = arith.constant 0 : index
    %3 = vector.load %arg3[%c0, %c0_1, %c0_2] : memref<1x4x256xf32, #tpu.memory_space<vmem>>, vector<1x4x256xf32>
    %4 = vector.shape_cast %3 : vector<1x4x256xf32> to vector<4x256xf32>
    %c0_3 = arith.constant 0 : index
    %c0_4 = arith.constant 0 : index
    %c0_5 = arith.constant 0 : index
    %5 = vector.load %arg4[%c0_3, %c0_4, %c0_5] : memref<1x1x256xi32, #tpu.memory_space<vmem>>, vector<1x1x256xi32>
    %6 = vector.shape_cast %5 : vector<1x1x256xi32> to vector<1x256xi32>
    %cst = arith.constant dense<0xFF800000> : vector<256xf32>
    %7 = vector.multi_reduction <maximumf>, %4, %cst [0] : vector<4x256xf32> to vector<256xf32>
    %8 = vector.shape_cast %7 : vector<256xf32> to vector<1x256xf32>
    %9 = vector.broadcast %8 : vector<1x256xf32> to vector<4x256xf32>
    %10 = arith.subf %4, %9 : vector<4x256xf32>
    %11 = math.exp %10 : vector<4x256xf32>
    %12 = tpu.iota {dimensions = array<i32: 0>} : vector<4x256xi32>
    %13 = vector.broadcast %6 : vector<1x256xi32> to vector<4x256xi32>
    %14 = arith.cmpi eq, %12, %13 : vector<4x256xi32>
    %cst_6 = arith.constant 0.000000e+00 : f32
    %15 = vector.broadcast %cst_6 : f32 to vector<4x256xf32>
    %16 = arith.select %14, %11, %15 : vector<4x256xi1>, vector<4x256xf32>
    %cst_7 = arith.constant dense<0.000000e+00> : vector<256xf32>
    %17 = vector.multi_reduction <add>, %11, %cst_7 [0] : vector<4x256xf32> to vector<256xf32>
    %18 = vector.shape_cast %17 : vector<256xf32> to vector<1x256xf32>
    %cst_8 = arith.constant dense<0.000000e+00> : vector<256xf32>
    %19 = vector.multi_reduction <add>, %16, %cst_8 [0] : vector<4x256xf32> to vector<256xf32>
    %20 = vector.shape_cast %19 : vector<256xf32> to vector<1x256xf32>
    %c1_i32 = arith.constant 1 : i32
    %21 = arith.muli %arg1, %c1_i32 : i32
    %22 = arith.addi %21, %arg2 : i32
    %23 = tpu.iota {dimensions = array<i32: 1>} : vector<1x256xi32>
    %c256_i32 = arith.constant 256 : i32
    %24 = arith.muli %22, %c256_i32 : i32
    %25 = vector.broadcast %24 : i32 to vector<1x256xi32>
    %26 = arith.addi %25, %23 : vector<1x256xi32>
    %c256_i32_9 = arith.constant 256 : i32
    %27 = vector.broadcast %c256_i32_9 : i32 to vector<1x256xi32>
    %28 = arith.cmpi slt, %26, %27 : vector<1x256xi32>
    %c0_i32_10 = arith.constant 0 : i32
    %29 = vector.broadcast %c0_i32_10 : i32 to vector<1x256xi32>
    %30 = arith.cmpi sge, %6, %29 : vector<1x256xi32>
    %c4_i32 = arith.constant 4 : i32
    %31 = vector.broadcast %c4_i32 : i32 to vector<1x256xi32>
    %32 = arith.cmpi slt, %6, %31 : vector<1x256xi32>
    %33 = arith.andi %30, %32 : vector<1x256xi1>
    %34 = tpu.reciprocal %18 : vector<1x256xf32> -> vector<1x256xf32>
    %c0_11 = arith.constant 0 : index
    %c0_12 = arith.constant 0 : index
    %35 = vector.load %arg6[%c0_11, %c0_12] : memref<8x256xf32, #tpu.memory_space<vmem>>, vector<1x256xf32>
    %36 = arith.mulf %20, %34 : vector<1x256xf32>
    %cst_13 = arith.constant 0.000000e+00 : f32
    %37 = vector.broadcast %cst_13 : f32 to vector<1x256xf32>
    %38 = arith.select %28, %36, %37 : vector<1x256xi1>, vector<1x256xf32>
    %39 = arith.addf %35, %38 : vector<1x256xf32>
    %c0_14 = arith.constant 0 : index
    %c0_15 = arith.constant 0 : index
    %40 = vector.load %arg6[%c0_14, %c0_15] : memref<8x256xf32, #tpu.memory_space<vmem>>, vector<1x256xf32>
    tpu.vector_store %arg6[%c0_14, %c0_15], %39 {strides = array<i32>} : memref<8x256xf32, #tpu.memory_space<vmem>>, vector<1x256xf32>,
    %c1 = arith.constant 1 : index
    %c0_16 = arith.constant 0 : index
    %41 = vector.load %arg6[%c1, %c0_16] : memref<8x256xf32, #tpu.memory_space<vmem>>, vector<1x256xf32>
    %42 = arith.extui %28 : vector<1x256xi1> to vector<1x256xi32>
    %43 = arith.sitofp %42 : vector<1x256xi32> to vector<1x256xf32>
    %44 = arith.addf %41, %43 : vector<1x256xf32>
    %c1_17 = arith.constant 1 : index
    %c0_18 = arith.constant 0 : index
    %45 = vector.load %arg6[%c1_17, %c0_18] : memref<8x256xf32, #tpu.memory_space<vmem>>, vector<1x256xf32>
    tpu.vector_store %arg6[%c1_17, %c0_18], %44 {strides = array<i32>} : memref<8x256xf32, #tpu.memory_space<vmem>>, vector<1x256xf32>,
    %c2 = arith.constant 2 : index
    %c0_19 = arith.constant 0 : index
    %46 = vector.load %arg6[%c2, %c0_19] : memref<8x256xf32, #tpu.memory_space<vmem>>, vector<1x256xf32>
    %47 = arith.andi %28, %33 : vector<1x256xi1>
    %48 = arith.extui %47 : vector<1x256xi1> to vector<1x256xi32>
    %49 = arith.sitofp %48 : vector<1x256xi32> to vector<1x256xf32>
    %50 = arith.addf %46, %49 : vector<1x256xf32>
    %c2_20 = arith.constant 2 : index
    %c0_21 = arith.constant 0 : index
    %51 = vector.load %arg6[%c2_20, %c0_21] : memref<8x256xf32, #tpu.memory_space<vmem>>, vector<1x256xf32>
    tpu.vector_store %arg6[%c2_20, %c0_21], %50 {strides = array<i32>} : memref<8x256xf32, #tpu.memory_space<vmem>>, vector<1x256xf32>,
    %c0_i32_22 = arith.constant 0 : i32
    %52 = arith.cmpi eq, %arg2, %c0_i32_22 : i32
    %53 = arith.extui %52 : i1 to i32
    %c0_i32_23 = arith.constant 0 : i32
    %54 = arith.cmpi ne, %53, %c0_i32_23 : i32
    scf.if %54 {
      %c0_24 = arith.constant 0 : index
      %c0_25 = arith.constant 0 : index
      %55 = vector.load %arg6[%c0_24, %c0_25] : memref<8x256xf32, #tpu.memory_space<vmem>>, vector<3x256xf32>
      %cst_26 = arith.constant dense<0.000000e+00> : vector<3xf32>
      %56 = vector.multi_reduction <add>, %55, %cst_26 [1] : vector<3x256xf32> to vector<3xf32>
      %57 = vector.shape_cast %56 : vector<3xf32> to vector<3x1xf32>
      %c0_27 = arith.constant 0 : index
      %c0_28 = arith.constant 0 : index
      %c0_29 = arith.constant 0 : index
      %c0_30 = arith.constant 0 : index
      %58 = vector.load %arg5[%c0_27, %c0_28, %c0_29, %c0_30] : memref<1x1x3x1xf32, #tpu.memory_space<vmem>>, vector<1x1x3x1xf32>
      %59 = vector.shape_cast %58 : vector<1x1x3x1xf32> to vector<3x1xf32>
      %60 = vector.shape_cast %57 : vector<3x1xf32> to vector<1x1x3x1xf32>
      tpu.vector_store %arg5[%c0_27, %c0_28, %c0_29, %c0_30], %60 {strides = array<i32>} : memref<1x1x3x1xf32, #tpu.memory_space<vmem>>, vector<1x1x3x1xf32>,
    } else {
    }
    return
  }
  func.func @transform_0(%arg0: i32, %arg1: i32, %arg2: i32) -> (i32, i32, i32) {
    %c1_i32 = arith.constant 1 : i32
    %0 = arith.muli %arg1, %c1_i32 : i32
    %1 = arith.addi %0, %arg2 : i32
    %c0_i32 = arith.constant 0 : i32
    %2 = arith.minsi %1, %c0_i32 : i32
    %c0_i32_0 = arith.constant 0 : i32
    %c0_i32_1 = arith.constant 0 : i32
    return %arg0, %c0_i32_0, %2 : i32, i32, i32
  }
  func.func @transform_1(%arg0: i32, %arg1: i32, %arg2: i32) -> (i32, i32, i32) {
    %c1_i32 = arith.constant 1 : i32
    %0 = arith.muli %arg1, %c1_i32 : i32
    %1 = arith.addi %0, %arg2 : i32
    %c0_i32 = arith.constant 0 : i32
    %2 = arith.minsi %1, %c0_i32 : i32
    %c0_i32_0 = arith.constant 0 : i32
    %c0_i32_1 = arith.constant 0 : i32
    return %arg0, %c0_i32_0, %2 : i32, i32, i32
  }
  func.func @transform_2(%arg0: i32, %arg1: i32, %arg2: i32) -> (i32, i32, i32, i32) {
    %c0_i32 = arith.constant 0 : i32
    %c0_i32_0 = arith.constant 0 : i32
    %c0_i32_1 = arith.constant 0 : i32
    return %arg0, %arg1, %c0_i32, %c0_i32_0 : i32, i32, i32, i32
  }
}

</mosaic_0001>

<bundles_post_ra>
// kernel: dice_loss_pallas.1
= control target key start
LH: loop header
LB: loop body
LE: loop exit
PB: predicated region body
PF: predicated region fallthrough
CT: control target
= control target key end

     0   :  { %s635_s9 = smov 0   ;;  %s637_s10 = smov 0   ;;  %s700_s0 = inlined_call_operand.vmem [shape: f32[2,4,256], index: 0, kind: input, shape index: {}]   ;;  %s701_s1 = inlined_call_operand.vmem [shape: s32[2,1,256], index: 1, kind: input, shape index: {}]   ;;  %s702_s2 = inlined_call_operand.vmem [shape: f32[2,1,3,1], index: 2, kind: output, shape index: {}]  }
   0x1   :  { %s639_s11 = smov 0  }
   0x2 LB: > { %s31_s12 = sadd.s32 1, %s611_s10  ;;  %p550_p0 = scmp.ge.s32.totalorder %s615_s11, 1  ;;  %s615_s11 = sphi %s639_s11, %s12_s11   ;;  %s611_s10 = sphi %s637_s10, %s706_s10   ;;  %s607_s9 = sphi %s635_s9, %s705_s9  }
   0x3   : > { %p33_p1 = scmp.ge.s32.totalorder %s31_s12, 2  ;;  %p180_p2 = scmp.lt.s32.totalorder %s615_s11, 3 }
   0x5   : > { %s708_s12 = smov (%p33_p1, %s31_s12), 0  ;;  %p181_p3 = pnand %p550_p0, %p180_p2 }
   0x6   : > { %p226_p4 = scmp.lt.s32.totalorder (!%p181_p3), %s607_s9, 1 }
   0x7   : > { %184 = sbr.rel (%p181_p3) target bundleno = 233 (0xe9), region = 28 }
   0xc   : > { %v617_v0 = vmov 0.0   ;;  %s710_s9 = smov (!%p226_p4, %s607_s9), 1  ;;  %vm274_vm0 = vcmask 1043456   ;;  %v297_v23 = vlaneseq  ;;  %v618_v32 = vmov 0  }
   0xd   : > { %264 = vst [vmem:[#allocation2] sm:$0xff] %v617_v0  ;;  %s559_s13 = sshll.u32 %s710_s9, 3  ;;  %s553_s17 = sshll.u32 %s710_s9, 1  ;;  %vm393_vm6 = vcmask 1040384   ;;  %v619_v42 = vmov 1.0  }
   0xe   : > { %265 = vst [vmem:[#allocation2 + $0x8] sm:$0xff] %v617_v0  ;;  %s233_s16 = scalar_lea.vmem %s700_s0, %s559_s13  ;;  %s248_s20 = scalar_lea.vmem %s701_s1, %s553_s17  ;;  %v298_v25 = vshrl.u32 %v297_v23, 7  ;;  %v411_v43 = vrot.slane %v619_v42, 7  ;;  %vm672_vm7 = vcmp.lt.s32.totalorder %v297_v23, 256 }
   0xf   : > { %v266_v1 = vld [vmem:[%s233_s16] sm:$0xff]  ;;  %s554_s21 = sshll.u32 %s710_s9, 2 }
  0x10   : > { %269 = vst [vmem:[#allocation1] ss:$2 sm:$0xff] %v266_v1  ;;  %v267_v24 = vld [vmem:[%s248_s20] sm:$0x3]  ;;  %v412_v52 = vsel %vm393_vm6, 1.0, %v411_v43  ;;  %s259_s24 = scalar_lea.vmem %s702_s2, %s554_s21 }
  0x11   : > { %v299_v26 = vperm.slane %v267_v24, 0  ;;  %v300_v27 = vperm.slane %v267_v24, 1  ;;  %vm354_vm1 = vcmp.ge.s32.totalorder %v267_v24, 0  ;;  %vm355_vm2 = vcmp.lt.s32.totalorder %v267_v24, 4 }
  0x12   : > { %vm356_vm5 = vmand %vm354_vm1, %vm355_vm2  ;;  %vm443_vm2 = vcmask 1042432  }
  0x13   : > { %vm301_vm3 = vcmp.eq.s32.totalorder %v298_v25, %v299_v26  ;;  %vm302_vm4 = vcmp.eq.s32.totalorder %v298_v25, %v300_v27  ;;  %v419_v33 = vsel %vm356_vm5, 1, %v618_v32 }
  0x14   : > { %v420_v44 = vperm.slane %v419_v33, 0  ;;  %v421_v45 = vperm.slane %v419_v33, 1 }
  0x15   : > { %v404_v48 = vld [vmem:[#allocation2 + $0x1] ss:$8 sm:$0x3]  ;;  %v418_v61 = vld [vmem:[#allocation2 + $0x2] ss:$8 sm:$0x3] }
  0x16   : > { %v414_v55 = vadd.f32 %v412_v52, %v404_v48  ;;  %vm422_vm8 = vcmp.ne.s32.totalorder %v420_v44, 0  ;;  %vm423_vm9 = vcmp.ne.s32.totalorder %v421_v45, 0 }
  0x17   : > { %v270_v2 = vld.sshfl [vmem:[#allocation1] sm:$0xff pattern:$0x75316420]  ;;  %v271_v3 = vld.sshfl [vmem:[#allocation1 + $0x8] sm:$0xff pattern:$0x75316420] }
  0x18   : > { %v275_v4 = vsel %vm274_vm0, %v270_v2, -inf  ;;  %v282_v5 = vsel %vm274_vm0, %v271_v3, -inf  ;;  %415 = vst.msk [vmem:[#allocation2 + $0x1] ss:$8 sm:$0x3] %vm672_vm7, %v414_v55  ;;  %v555_v58 = vsel %vm422_vm8, 1.0, %v617_v0 }
  0x19   : > { %v276_v6 = vrot.slane %v275_v4, 4  ;;  %v283_v7 = vrot.slane %v282_v5, 4  ;;  %v556_v59 = vsel %vm423_vm9, 1.0, %v617_v0 }
  0x1a   : > { %v432_v62 = vrot.slane %v556_v59, 7 }
  0x1b   : > { %v277_v8 = vmax.f32 %v275_v4, %v276_v6  ;;  %v284_v9 = vmax.f32 %v282_v5, %v283_v7 }
  0x1c   : > { %v433_v3 = vsel %vm393_vm6, %v555_v58, %v432_v62 }
  0x1d   : > { %v278_v10 = vrot.slane %v277_v8, 2  ;;  %v285_v11 = vrot.slane %v284_v9, 2  ;;  %v435_v6 = vadd.f32 %v433_v3, %v418_v61 }
  0x1f   : > { %v279_v12 = vmax.f32 %v277_v8, %v278_v10  ;;  %v286_v13 = vmax.f32 %v284_v9, %v285_v11  ;;  %436 = vst.msk [vmem:[#allocation2 + $0x2] ss:$8 sm:$0x3] %vm672_vm7, %v435_v6 }
  0x21   : > { %v280_v14 = vrot.slane %v279_v12, 1  ;;  %v287_v15 = vrot.slane %v286_v13, 1 }
  0x23   : > { %v281_v16 = vmax.f32 %v279_v12, %v280_v14  ;;  %v288_v17 = vmax.f32 %v286_v13, %v287_v15 }
  0x25   : > { %v291_v18 = vrot.slane %v288_v17, 4 }
  0x27   : > { %v292_v19 = vsel %vm274_vm0, %v281_v16, %v291_v18 }
  0x28   : > { %v294_v20 = vsub.f32 %v266_v1, %v292_v19 }
  0x2a   : > { %v295_v21 = vmul.f32 1.442695, %v294_v20 }
  0x2c   : > { %587 = vpow2.f32 %v295_v21 }
  0x32   : > { %v588_v22 = vpop.eup %587 }
  0x33   : > { %304 = vst [vmem:[#allocation1] ss:$2 sm:$0xff] %v588_v22 }
  0x3a   : > { %v305_v28 = vld.sshfl [vmem:[#allocation1] sm:$0xff pattern:$0x75316420]  ;;  %v306_v29 = vld.sshfl [vmem:[#allocation1 + $0x8] sm:$0xff pattern:$0x75316420] }
  0x3b   : > { %311 = vst [vmem:[#allocation1] ss:$2 sm:$0xff] %v588_v22  ;;  %v309_v30 = vsel %vm301_vm3, %v305_v28, 0.0  ;;  %v310_v31 = vsel %vm302_vm4, %v306_v29, 0.0  ;;  %vm449_vm3 = vcmask 2048  }
  0x3c   : > { %v330_v38 = vsel %vm274_vm0, %v309_v30, 0.0  ;;  %v337_v39 = vsel %vm274_vm0, %v310_v31, 0.0 }
  0x3d   : > { %v331_v49 = vrot.slane %v330_v38, 4  ;;  %v338_v50 = vrot.slane %v337_v39, 4 }
  0x3f   : > { %v332_v60 = vadd.f32 %v331_v49, %v330_v38  ;;  %v339_v2 = vadd.f32 %v338_v50, %v337_v39 }
  0x41   : > { %v333_v7 = vrot.slane %v332_v60, 2  ;;  %v340_v8 = vrot.slane %v339_v2, 2 }
  0x42   : > { %v312_v34 = vld.sshfl [vmem:[#allocation1] sm:$0xff pattern:$0x75316420]  ;;  %v313_v35 = vld.sshfl [vmem:[#allocation1 + $0x8] sm:$0xff pattern:$0x75316420] }
  0x43   : > { %v316_v36 = vsel %vm274_vm0, %v312_v34, 0.0  ;;  %v323_v37 = vsel %vm274_vm0, %v313_v35, 0.0  ;;  %v334_v9 = vadd.f32 %v333_v7, %v332_v60  ;;  %v341_v0 = vadd.f32 %v340_v8, %v339_v2 }
  0x44   : > { %v317_v40 = vrot.slane %v316_v36, 4  ;;  %v324_v41 = vrot.slane %v323_v37, 4 }
  0x45   : > { %v335_v12 = vrot.slane %v334_v9, 1  ;;  %v342_v14 = vrot.slane %v341_v0, 1 }
  0x46   : > { %v318_v46 = vadd.f32 %v317_v40, %v316_v36  ;;  %v325_v47 = vadd.f32 %v324_v41, %v323_v37  ;;  %v385_v36 = vld [vmem:[#allocation2] ss:$8 sm:$0x3] }
  0x47   : > { %v336_v27 = vadd.f32 %v335_v12, %v334_v9  ;;  %v343_v28 = vadd.f32 %v342_v14, %v341_v0 }
  0x48   : > { %v319_v53 = vrot.slane %v318_v46, 2  ;;  %v326_v54 = vrot.slane %v325_v47, 2 }
  0x4a   : > { %v320_v56 = vadd.f32 %v319_v53, %v318_v46  ;;  %v327_v57 = vadd.f32 %v326_v54, %v325_v47 }
  0x4c   : > { %v321_v63 = vrot.slane %v320_v56, 1  ;;  %v328_v1 = vrot.slane %v327_v57, 1 }
  0x4e   : > { %v322_v4 = vadd.f32 %v321_v63, %v320_v56  ;;  %v329_v5 = vadd.f32 %v328_v1, %v327_v57 }
  0x50   : > { %589 = vrcp.f32 %v322_v4  ;;  %vm362_vm10 = vweird.f32 %v322_v4  ;;  %v368_v15 = vand.u32 2147483648, %v322_v4  ;;  %v366_v18 = vand.u32 2147483647, %v322_v4 }
  0x51   : > { %591 = vrcp.f32 %v329_v5  ;;  %v382_v19 = vand.u32 2147483648, %v329_v5  ;;  %vm376_vm12 = vweird.f32 %v329_v5  ;;  %v380_v21 = vand.u32 2147483647, %v329_v5 }
  0x52   : > { %v369_v23 = vor.u32 1.1754944e-38, %v368_v15  ;;  %vm367_vm15 = vcmp.eq.f32.partialorder %v366_v18, 8.507059e+37 }
  0x53   : > { %v383_v26 = vor.u32 1.1754944e-38, %v382_v19  ;;  %vm381_vm1 = vcmp.eq.f32.partialorder %v380_v21, 8.507059e+37 }
  0x56   : > { %v590_v10 = vpop.eup %589 }
  0x57   : > { %v592_v11 = vpop.eup %591  ;;  %v358_v13 = vmul.f32 %v590_v10, %v322_v4  ;;  %vm363_vm11 = vweird.f32 %v590_v10 }
  0x58   : > { %v372_v16 = vmul.f32 %v592_v11, %v329_v5  ;;  %vm377_vm13 = vweird.f32 %v592_v11  ;;  %vm364_vm14 = vmor %vm362_vm10, %vm363_vm11 }
  0x59   : > { %v359_v17 = vsub.f32 1.0, %v358_v13  ;;  %vm378_vm0 = vmor %vm376_vm12, %vm377_vm13 }
  0x5a   : > { %v373_v20 = vsub.f32 1.0, %v372_v16 }
  0x5b   : > { %v360_v22 = vmul.f32 %v590_v10, %v359_v17 }
  0x5c   : > { %v374_v24 = vmul.f32 %v592_v11, %v373_v20 }
  0x5d   : > { %v361_v25 = vadd.f32 %v590_v10, %v360_v22 }
  0x5e   : > { %v375_v29 = vadd.f32 %v592_v11, %v374_v24 }
  0x5f   : > { %v365_v30 = vsel %vm364_vm14, %v590_v10, %v361_v25 }
  0x60   : > { %v370_v31 = vsel %vm367_vm15, %v369_v23, %v365_v30  ;;  %v379_v32 = vsel %vm378_vm0, %v592_v11, %v375_v29 }
  0x61   : > { %v384_v33 = vsel %vm381_vm1, %v383_v26, %v379_v32  ;;  %v386_v34 = vmul.f32 %v370_v31, %v336_v27 }
  0x62   : > { %v387_v35 = vmul.f32 %v384_v33, %v343_v28 }
  0x64   : > { %v392_v37 = vrot.slane %v387_v35, 7 }
  0x66   : > { %v394_v38 = vsel %vm393_vm6, %v386_v34, %v392_v37 }
  0x67   : > { %v396_v39 = vadd.f32 %v394_v38, %v385_v36 }
  0x69   : > { %401 = vst.msk [vmem:[#allocation2] ss:$8 sm:$0x3] %vm672_vm7, %v396_v39 }
  0x70   : > { %v441_v40 = vld [vmem:[#allocation2] sm:$0x7]  ;;  %v442_v41 = vld [vmem:[#allocation2 + $0x8] sm:$0x7] }
  0x71   : > { %v444_v42 = vsel %vm443_vm2, %v441_v40, 0.0  ;;  %v445_v43 = vsel %vm443_vm2, %v442_v41, 0.0 }
  0x72   : > { %v446_v44 = vadd.f32 %v445_v43, %v444_v42 }
  0x74   : > { %447 = vadd.xlane.f32.xlu0 %v446_v44 }
  0xe7   : > { %v448_v45 = vpop.xlane.xlu0 %447 }
  0xe8   : > { %450 = vst.msk [vmem:[%s259_s24] sm:$0x7] %vm449_vm3, %v448_v45 }
  0xe9 PF: > { %s12_s11 = sadd.s32 1, %s615_s11   ;;  %s705_s9 = smov %s611_s10 }
  0xea   : > { %p9_p5 = scmp.ge.s32.totalorder %s12_s11, 4   ;;  %s706_s10 = smov %s708_s12 }
  0xec   :  { %11 = sbr.rel (!%p9_p5) target bundleno = 2 (0x2), region = 71 }

</bundles_post_ra>
